<compile_context>
chip_gen: v6e
topology: v6e:2x2x1
jax: 0.10.0
libtpu: 0.0.40
codegen_flags: <defaults>
</compile_context>

<pallas_src>
import jax
import jax.numpy as jnp
from jax.experimental import pallas as pl
from jax.experimental.pallas import tpu as pltpu


def _center_kernel(m_ref, x_ref, o_ref):
    # m_ref: (TM, 1) per-row means; x_ref/o_ref: (TM, CHUNK) tiles.
    o_ref[...] = x_ref[...] - m_ref[...]


def _largest_aligned_divisor(n: int, align: int, cap: int) -> int:
    """Largest d with d % align == 0, n % d == 0, d <= cap (assumes n % align == 0)."""
    cap = min(cap, n)
    cap = (cap // align) * align
    for d in range(cap, align - 1, -align):
        if n % d == 0:
            return d
    return align


def input_center(x: jax.Array, means: jax.Array) -> jax.Array:
    """x: (B, C, H, W); means: (C,). Returns x - means[None, :, None, None]."""
    B, C, H, W = x.shape
    R, N = B * C, H * W

    # Free contiguous reshape: lane axis becomes the full spatial extent.
    xf = x.reshape(R, N)
    # Tiny (B*C, 1) column of per-row means (dtype matches x; deliberate choice,
    # matches the effectively-f32 image path of the PyTorch module).
    m_col = jnp.broadcast_to(means.astype(x.dtype)[None, :], (B, C)).reshape(R, 1)

    itemsize = jnp.dtype(x.dtype).itemsize
    sub = 16 if itemsize == 2 else 8              # sublane alignment
    target_elems = (2 * 1024 * 1024) // itemsize  # ~2 MiB input tile budget

    # Lane (last) dim: multiple of 128 dividing N, else the full dim.
    if N % 128 == 0:
        chunk = _largest_aligned_divisor(N, 128, max(128, target_elems // sub))
    else:
        chunk = N
    # Row dim: multiple of `sub` dividing R, else the full dim.
    rows_budget = max(sub, (max(1, target_elems // chunk) // sub) * sub)
    if R % sub == 0:
        tm = _largest_aligned_divisor(R, sub, rows_budget)
    else:
        tm = R

    grid = (R // tm, N // chunk)

    out_flat = pl.pallas_call(
        _center_kernel,
        out_shape=jax.ShapeDtypeStruct((R, N), x.dtype),
        grid=grid,
        in_specs=[
            pl.BlockSpec((tm, 1), lambda i, j: (i, 0)),      # per-row means
            pl.BlockSpec((tm, chunk), lambda i, j: (i, j)),  # input tile
        ],
        out_specs=pl.BlockSpec((tm, chunk), lambda i, j: (i, j)),
        compiler_params=pltpu.CompilerParams(
            dimension_semantics=("parallel", "parallel")
        ),
    )(m_col, xf)

    return out_flat.reshape(B, C, H, W)


if __name__ == "__main__":
    key = jax.random.PRNGKey(0)
    B, C, H, W = 2, 4, 16, 16

    x = jax.random.normal(key, (B, C, H, W), dtype=jnp.float32)
    # Module __init__ takes a List[float] of length C.
    means = jnp.array([0.485, 0.456, 0.406, 0.5], dtype=jnp.float32)

    out = input_center(x, means)
    jax.block_until_ready(out)

    # Reference = PyTorch forward semantics: broadcast-subtract per channel.
    ref = x - means[None, :, None, None]
    assert out.shape == (B, C, H, W)
    assert jnp.allclose(out, ref, atol=1e-6), "mismatch vs reference"

    print("KERNEL_OK")
</pallas_src>

<mosaic_0001>
module attributes {stable_mosaic.version = 11 : i64} {
  func.func @_center_kernel(%arg0: i32, %arg1: i32, %arg2: memref<8x1xf32, #tpu.memory_space<vmem>>, %arg3: memref<8x256xf32, #tpu.memory_space<vmem>>, %arg4: memref<8x256xf32, #tpu.memory_space<vmem>>) attributes {dimension_semantics = [#tpu.dimension_semantics<parallel>, #tpu.dimension_semantics<parallel>], iteration_bounds = array<i64: 1, 1>, scalar_prefetch = 0 : i64, scratch_operands = 0 : i64, tpu.core_type = #tpu.core_type<tc>, window_params = [{transform_indices = @transform_0, window_bounds = array<i64: 8, 1>}, {transform_indices = @transform_1, window_bounds = array<i64: 8, 256>}, {transform_indices = @transform_2, window_bounds = array<i64: 8, 256>}]} {
    %c0 = arith.constant 0 : index
    %c0_0 = arith.constant 0 : index
    %0 = vector.load %arg3[%c0, %c0_0] : memref<8x256xf32, #tpu.memory_space<vmem>>, vector<8x256xf32>
    %c0_1 = arith.constant 0 : index
    %c0_2 = arith.constant 0 : index
    %1 = vector.load %arg2[%c0_1, %c0_2] : memref<8x1xf32, #tpu.memory_space<vmem>>, vector<8x1xf32>
    %2 = vector.broadcast %1 : vector<8x1xf32> to vector<8x256xf32>
    %3 = arith.subf %0, %2 : vector<8x256xf32>
    %c0_3 = arith.constant 0 : index
    %c0_4 = arith.constant 0 : index
    %4 = vector.load %arg4[%c0_3, %c0_4] : memref<8x256xf32, #tpu.memory_space<vmem>>, vector<8x256xf32>
    tpu.vector_store %arg4[%c0_3, %c0_4], %3 {strides = array<i32>} : memref<8x256xf32, #tpu.memory_space<vmem>>, vector<8x256xf32>,
    return
  }
  func.func @transform_0(%arg0: i32, %arg1: i32) -> (i32, i32) {
    %c0_i32 = arith.constant 0 : i32
    %c0_i32_0 = arith.constant 0 : i32
    return %arg0, %c0_i32 : i32, i32
  }
  func.func @transform_1(%arg0: i32, %arg1: i32) -> (i32, i32) {
    %c0_i32 = arith.constant 0 : i32
    return %arg0, %arg1 : i32, i32
  }
  func.func @transform_2(%arg0: i32, %arg1: i32) -> (i32, i32) {
    %c0_i32 = arith.constant 0 : i32
    return %arg0, %arg1 : i32, i32
  }
}

</mosaic_0001>

<bundles_post_ra>
// kernel: tpu_custom_call.1
= control target key start
LH: loop header
LB: loop body
LE: loop exit
PB: predicated region body
PF: predicated region fallthrough
CT: control target
= control target key end

     0   :  { %7 = vsyncpa [#allocation3], 0  ;;  %s126_s0 = inlined_call_operand.vmem [shape: f32[8,1], index: 0, kind: input, shape index: {}]   ;;  %s127_s1 = inlined_call_operand.hbm [shape: f32[8,256], index: 1, kind: input, shape index: {}]   ;;  %s128_s2 = inlined_call_operand.hbm [shape: f32[8,256], index: 2, kind: output, shape index: {}]  }
   0x1   :  { %8 = vsyncpa [#allocation4], 0  ;;  %s99_s9 = smov [#allocation2]  }
   0x2   :  { %s17_s10 = sshll.u32 %s99_s9, 4  ;;  %s18_s10 = int_to_ptr.vmem [resolvable:$true] %s17_s10 }
   0x3   :  { %s63_s11 = scalar_lea.vmem %s18_s10, 256  ;;  %p68_p1 = scmp.lt.s32.totalorder %s18_s10, %s18_s10 }
   0x4   :  { %p64_p0 = scmp.ne.s32.totalorder %s18_s10, %s63_s11  ;;  %p69_p2 = scmp.lt.s32.totalorder %s63_s11, %s63_s11 }
   0x6   :  { %p70_p3 = por %p69_p2, %p68_p1 }
   0x8   :  { %p71_p4 = pnand %p70_p3, %p64_p0 }
   0xa   :  { %74 = shalt.err (!%p71_p4)
}
   0xb   :  { %20 = dma.hbm_to_vmem [thread:$0]  %s127_s1, 256, %s18_s10, [#allocation3]  }
   0xc   :  { %95 = dma.done.wait [#allocation3], 256  }
   0xd   :  { %96 = vsyncadd [#allocation3], 4294967040  ;;  %v100_v0 = vmov 0   ;;  %v26_v1 = vld [vmem:[%s126_s0] sm:$0xff]  ;;  %v25_v3 = vld [vmem:[#allocation2 + $0x8] sm:$0xff]  ;;  %s101_s16 = smov [#allocation5]  }
   0xe   :  { %54 = vset.pattern.permute.xlu0 %v100_v0  ;;  %v24_v2 = vld [vmem:[#allocation2] sm:$0xff]  ;;  %s42_s17 = sshll.u32 %s101_s16, 4  ;;  %s43_s17 = int_to_ptr.vmem [resolvable:$true] %s42_s17 }
   0xf   :  { %29 = vperm.xlu0 %54, %v26_v1   ;;  %s75_s1 = scalar_lea.vmem %s43_s17, 256  ;;  %p80_p6 = scmp.lt.s32.totalorder %s43_s17, %s43_s17 }
  0x10   :  { %p76_p5 = scmp.ne.s32.totalorder %s43_s17, %s75_s1  ;;  %p81_p7 = scmp.lt.s32.totalorder %s75_s1, %s75_s1 }
  0x12   :  { %p82_p8 = por %p81_p7, %p80_p6 }
  0x14   :  { %p83_p9 = pnand %p82_p8, %p76_p5 }
  0x8a   :  { %v30_v4 = vpop.permute.xlu0 %29 }
  0x8b   :  { %v32_v5 = vsub.f32 %v24_v2, %v30_v4  ;;  %v33_v6 = vsub.f32 %v25_v3, %v30_v4 }
  0x8d   :  { %34 = vst [vmem:[#allocation5] sm:$0xff] %v32_v5  ;;  %35 = vst [vmem:[#allocation5 + $0x8] sm:$0xff] %v33_v6 }
  0x8e   :  { %86 = shalt.err (!%p83_p9)
}
  0x8f   :  { %45 = dma.vmem_to_hbm [thread:$0]  %s43_s17, 256, %s128_s2, [#allocation4]  }
  0x90   :  { %97 = dma.done.wait [#allocation4], 256  }
  0x91   :  { %98 = vsyncadd [#allocation4], 4294967040 }
  0x92   :  { %49 = vsyncpa [#allocation3], 1 }
  0x93   :  { %50 = vsyncpa [#allocation4], 1 }

</bundles_post_ra>
